<compile_context>
chip_gen: v7x
topology: tpu7x:2x2x1
jax: 0.10.0
libtpu: 0.0.40
codegen_flags: <defaults>
</compile_context>

<pallas_src>
import functools

import jax
import jax.numpy as jnp
from jax import lax
from jax.experimental import pallas as pl
from jax.experimental.pallas import tpu as pltpu


# ----------------------------------------------------------------------------
# Pallas kernels
# ----------------------------------------------------------------------------
def linear_kernel(x_ref, w_ref, b_ref, o_ref):
    # x: [tm, Cin], w: [Cin, Cout] (pre-transposed in wrapper), b: [1, Cout]
    o_ref[...] = (jnp.dot(x_ref[...], w_ref[...],
                          preferred_element_type=jnp.float32)
                  + b_ref[...]).astype(o_ref.dtype)


def linear(x, w_t, b, *, tm=256):
    """y = x @ w_t + b with w_t already [Cin, Cout] (one-time wrapper transpose).

    Row-tiled so large B*N pipelines through VMEM (double-buffered DMA) instead
    of one whole-problem resident block.
    """
    m, cin = x.shape
    cout = w_t.shape[1]
    tm = min(tm, m)
    return pl.pallas_call(
        linear_kernel,
        out_shape=jax.ShapeDtypeStruct((m, cout), jnp.float32),
        grid=(pl.cdiv(m, tm),),
        in_specs=[
            pl.BlockSpec((tm, cin), lambda i: (i, 0)),
            pl.BlockSpec((cin, cout), lambda i: (0, 0)),
            pl.BlockSpec((1, cout), lambda i: (0, 0)),
        ],
        out_specs=pl.BlockSpec((tm, cout), lambda i: (i, 0)),
        compiler_params=pltpu.CompilerParams(
            dimension_semantics=("parallel",)),
    )(x, w_t, b.reshape(1, cout))


def performer_kernel(qkv_ref, proj_ref, o_ref, *, num_heads, head_dim):
    # qkv_ref : [1, N, 3, C]  fused q/k/v projection output (heads packed in C)
    # proj_ref: [H, D, M]     random projection, pre-transposed once in wrapper
    # o_ref   : [1, N, C]     lane-dense output block (heads concatenated in C)
    qkv = qkv_ref[0]            # [N, 3, C]
    proj = proj_ref[...]        # [H, D, M]

    D = head_dim
    M = proj.shape[-1]
    data_normalizer = float(D) ** (-0.25)
    ratio = float(M) ** (-0.5)
    feat_eps = 1e-4
    norm_eps = 0.01

    # num_heads is a small static constant -> unrolled Python loop over heads.
    for h in range(num_heads):
        sl = slice(h * D, (h + 1) * D)
        q = qkv[:, 0, sl]       # [N, D]
        k = qkv[:, 1, sl]       # [N, D]
        v = qkv[:, 2, sl]       # [N, D]
        pj = proj[h]            # [D, M]

        # favorp projection for queries (per-row stabilizer).
        q_dash = jnp.dot(q * data_normalizer, pj,
                         preferred_element_type=jnp.float32)            # [N, M]
        q_diag = (jnp.sum(q * q, axis=-1, keepdims=True) * 0.5
                  * data_normalizer * data_normalizer)                  # [N, 1]
        q_stab = jnp.max(q_dash, axis=-1, keepdims=True)                # [N, 1]
        q_prime = ratio * jnp.exp(q_dash - q_diag - q_stab) + feat_eps  # [N, M]

        # favorp projection for keys (global per-head stabilizer).
        k_dash = jnp.dot(k * data_normalizer, pj,
                         preferred_element_type=jnp.float32)            # [N, M]
        k_diag = (jnp.sum(k * k, axis=-1, keepdims=True) * 0.5
                  * data_normalizer * data_normalizer)                  # [N, 1]
        k_stab = jnp.max(k_dash, axis=(0, 1), keepdims=True)            # [1, 1]
        k_prime = ratio * jnp.exp(k_dash - k_diag - k_stab) + feat_eps  # [N, M]

        # Linear-attention contraction: k'^T v without transposing k'.
        kv = lax.dot_general(k_prime, v, (((0,), (0,)), ((), ())),
                             preferred_element_type=jnp.float32)        # [M, D]
        qkv_h = jnp.dot(q_prime, kv,
                        preferred_element_type=jnp.float32)             # [N, D]

        k_sum = jnp.sum(k_prime, axis=0, keepdims=True)                 # [1, M]
        normalizer = lax.dot_general(q_prime, k_sum,
                                     (((1,), (1,)), ((), ())),
                                     preferred_element_type=jnp.float32)  # [N,1]
        normalizer = jnp.maximum(normalizer, norm_eps)
        inv = pl.reciprocal(normalizer, approx=True)

        o_ref[0, :, sl] = (qkv_h * inv).astype(o_ref.dtype)


def performer_attention_core(qkv, proj_t, num_heads):
    """qkv: [B, N, 3, C] f32; proj_t: [H, D, M] f32 -> [B, N, C] f32."""
    B, N, _, C = qkv.shape
    H, D, M = proj_t.shape
    kernel = functools.partial(performer_kernel,
                               num_heads=num_heads, head_dim=D)
    return pl.pallas_call(
        kernel,
        out_shape=jax.ShapeDtypeStruct((B, N, C), jnp.float32),
        grid=(B,),
        in_specs=[
            pl.BlockSpec((1, N, 3, C), lambda b: (b, 0, 0, 0)),
            # proj block index is constant over the grid -> fetched once.
            pl.BlockSpec((H, D, M), lambda b: (0, 0, 0)),
        ],
        out_specs=pl.BlockSpec((1, N, C), lambda b: (b, 0, 0)),
        compiler_params=pltpu.CompilerParams(
            dimension_semantics=("parallel",)),
    )(qkv, proj_t)


# ----------------------------------------------------------------------------
# Parameter construction (deterministic, init-time glue in plain JAX)
# ----------------------------------------------------------------------------
def gaussian_orthogonal_random_matrix(key, nb_rows, nb_cols):
    nb_full_blocks = nb_rows // nb_cols
    keys = jax.random.split(key, nb_full_blocks + 2)
    blocks = []
    for i in range(nb_full_blocks):
        g = jax.random.normal(keys[i], (nb_cols, nb_cols), dtype=jnp.float32)
        q, _ = jnp.linalg.qr(g)
        blocks.append(q.T)
    remaining = nb_rows - nb_full_blocks * nb_cols
    if remaining > 0:
        g = jax.random.normal(keys[nb_full_blocks], (nb_cols, nb_cols),
                              dtype=jnp.float32)
        q, _ = jnp.linalg.qr(g)
        blocks.append(q.T[:remaining])
    final = jnp.concatenate(blocks, axis=0)
    multiplier = jnp.linalg.norm(
        jax.random.normal(keys[-1], (nb_rows, nb_cols), dtype=jnp.float32),
        axis=1)
    return multiplier[:, None] * final


def create_proj_matrix(key, num_heads, proj_dim, input_dim):
    keys = jax.random.split(key, num_heads)
    return jnp.stack(
        [gaussian_orthogonal_random_matrix(keys[h], proj_dim, input_dim)
         for h in range(num_heads)], axis=0)


def init_params(key, embed_dim, num_heads, approx_attn_dim):
    head_dim = embed_dim // num_heads
    ks = jax.random.split(key, 5)

    def lin(k):
        w = 0.02 * jax.random.normal(k, (embed_dim, embed_dim),
                                     dtype=jnp.float32)
        b = jnp.zeros((embed_dim,), dtype=jnp.float32)
        return w, b

    wq, bq = lin(ks[0])
    wk, bk = lin(ks[1])
    wv, bv = lin(ks[2])
    wo, bo = lin(ks[3])
    proj = create_proj_matrix(ks[4], num_heads, approx_attn_dim, head_dim)

    # One-time layout plumbing so the kernels never transpose:
    wqkv_t = jnp.concatenate([wq, wk, wv], axis=0).T     # [C, 3C]
    bqkv = jnp.concatenate([bq, bk, bv], axis=0)         # [3C]
    wo_t = wo.T                                          # [C, C]
    proj_t = jnp.swapaxes(proj, 1, 2)                    # [H, D, M]

    return dict(wq=wq, bq=bq, wk=wk, bk=bk, wv=wv, bv=bv, wo=wo, bo=bo,
                proj=proj, wqkv_t=wqkv_t, bqkv=bqkv, wo_t=wo_t, proj_t=proj_t)


# ----------------------------------------------------------------------------
# Full forward (matches PerformerAttention.forward in eval mode)
# ----------------------------------------------------------------------------
def performer_attention_forward(query, H, W, params, num_heads):
    # H, W are unused by the forward computation (kept for API fidelity).
    del H, W
    B, N, C = query.shape
    x2d = query.reshape(B * N, C).astype(jnp.float32)

    # Fused q/k/v projection: single kernel, x read once, wide MXU N-dim.
    qkv2d = linear(x2d, params["wqkv_t"], params["bqkv"])   # [B*N, 3C]
    qkv = qkv2d.reshape(B, N, 3, C)                          # free view

    out = performer_attention_core(qkv, params["proj_t"], num_heads)  # [B,N,C]

    out2d = out.reshape(B * N, C)                            # free view
    out2d = linear(out2d, params["wo_t"], params["bo"])
    return out2d.reshape(B, N, C)


# ----------------------------------------------------------------------------
# Pure-JAX reference for a sanity check
# ----------------------------------------------------------------------------
def reference_forward(query, params, num_heads):
    B, N, C = query.shape
    D = C // num_heads
    x = query.astype(jnp.float32)
    q = x @ params["wq"].T + params["bq"]
    k = x @ params["wk"].T + params["bk"]
    v = x @ params["wv"].T + params["bv"]

    def split(t):
        return t.reshape(B, N, num_heads, D).transpose(0, 2, 1, 3)

    q, k, v = split(q), split(k), split(v)
    proj = params["proj"]

    def favorp(data, is_query):
        dn = data.shape[-1] ** (-0.25)
        ratio = proj.shape[1] ** (-0.5)
        dd = jnp.einsum("bhnd,hjd->bhnj", dn * data, proj)
        diag = (jnp.sum(data ** 2, axis=-1) / 2.0 * dn * dn)[..., None]
        if is_query:
            stab = jnp.max(dd, axis=-1, keepdims=True)
        else:
            stab = jnp.max(dd, axis=(-1, -2), keepdims=True)
        return ratio * jnp.exp(dd - diag - stab) + 1e-4

    qp, kp = favorp(q, True), favorp(k, False)
    kv = jnp.einsum("bhnm,bhnd->bhmd", kp, v)
    qkv = jnp.einsum("bhnm,bhmd->bhnd", qp, kv)
    normalizer = jnp.einsum("bhnm,bhm->bhn", qp, kp.sum(axis=-2))
    out = qkv / jnp.maximum(normalizer, 0.01)[..., None]
    out = out.transpose(0, 2, 1, 3).reshape(B, N, C)
    return out @ params["wo"].T + params["bo"]


if __name__ == "__main__":
    EMBED_DIM = 32
    NUM_HEADS = 2
    APPROX_ATTN_DIM = 64
    B, H, W = 2, 4, 4
    N = H * W  # 16

    key = jax.random.PRNGKey(0)
    k_params, k_x = jax.random.split(key)
    params = init_params(k_params, EMBED_DIM, NUM_HEADS, APPROX_ATTN_DIM)
    query = jax.random.normal(k_x, (B, N, EMBED_DIM), dtype=jnp.float32)

    out = performer_attention_forward(query, H, W, params, NUM_HEADS)
    out = jax.block_until_ready(out)

    ref = jax.block_until_ready(reference_forward(query, params, NUM_HEADS))
    assert out.shape == (B, N, EMBED_DIM)
    assert bool(jnp.allclose(out, ref, atol=2e-2, rtol=2e-2)), \
        "mismatch vs reference"

    print("KERNEL_OK")
</pallas_src>

<mosaic_0001>
module attributes {stable_mosaic.version = 11 : i64} {
  func.func @linear_kernel(%arg0: i32, %arg1: memref<32x32xf32, #tpu.memory_space<vmem>>, %arg2: memref<32x96xf32, #tpu.memory_space<vmem>>, %arg3: memref<1x96xf32, #tpu.memory_space<vmem>>, %arg4: memref<32x96xf32, #tpu.memory_space<vmem>>) attributes {dimension_semantics = [#tpu.dimension_semantics<parallel>], iteration_bounds = array<i64: 1>, scalar_prefetch = 0 : i64, scratch_operands = 0 : i64, tpu.core_type = #tpu.core_type<tc>, window_params = [{transform_indices = @transform_0, window_bounds = array<i64: 32, 32>}, {pipeline_mode = #tpu.pipeline_mode<synchronous>, transform_indices = @transform_1, window_bounds = array<i64: 32, 96>}, {pipeline_mode = #tpu.pipeline_mode<synchronous>, transform_indices = @transform_2, window_bounds = array<i64: 1, 96>}, {transform_indices = @transform_3, window_bounds = array<i64: 32, 96>}]} {
    %c0 = arith.constant 0 : index
    %c0_0 = arith.constant 0 : index
    %0 = vector.load %arg1[%c0, %c0_0] : memref<32x32xf32, #tpu.memory_space<vmem>>, vector<32x32xf32>
    %c0_1 = arith.constant 0 : index
    %c0_2 = arith.constant 0 : index
    %1 = vector.load %arg2[%c0_1, %c0_2] : memref<32x96xf32, #tpu.memory_space<vmem>>, vector<32x96xf32>
    %cst = arith.constant dense<0.000000e+00> : vector<32x96xf32>
    %2 = tpu.matmul %0, %1, %cst {dimension_numbers = #tpu.dot_dimension_numbers<[1], [0], [0], [1], [0, 0, 1, 1], [], []>} : vector<32x32xf32>, vector<32x96xf32>, vector<32x96xf32> -> vector<32x96xf32>
    %c0_3 = arith.constant 0 : index
    %c0_4 = arith.constant 0 : index
    %3 = vector.load %arg3[%c0_3, %c0_4] : memref<1x96xf32, #tpu.memory_space<vmem>>, vector<1x96xf32>
    %4 = vector.broadcast %3 : vector<1x96xf32> to vector<32x96xf32>
    %5 = arith.addf %2, %4 : vector<32x96xf32>
    %c0_5 = arith.constant 0 : index
    %c0_6 = arith.constant 0 : index
    %6 = vector.load %arg4[%c0_5, %c0_6] : memref<32x96xf32, #tpu.memory_space<vmem>>, vector<32x96xf32>
    tpu.vector_store %arg4[%c0_5, %c0_6], %5 {strides = array<i32>} : memref<32x96xf32, #tpu.memory_space<vmem>>, vector<32x96xf32>,
    return
  }
  func.func @transform_0(%arg0: i32) -> (i32, i32) {
    %c0_i32 = arith.constant 0 : i32
    %c0_i32_0 = arith.constant 0 : i32
    return %arg0, %c0_i32 : i32, i32
  }
  func.func @transform_1(%arg0: i32) -> (i32, i32) {
    %c0_i32 = arith.constant 0 : i32
    %c0_i32_0 = arith.constant 0 : i32
    %c0_i32_1 = arith.constant 0 : i32
    return %c0_i32, %c0_i32_0 : i32, i32
  }
  func.func @transform_2(%arg0: i32) -> (i32, i32) {
    %c0_i32 = arith.constant 0 : i32
    %c0_i32_0 = arith.constant 0 : i32
    %c0_i32_1 = arith.constant 0 : i32
    return %c0_i32, %c0_i32_0 : i32, i32
  }
  func.func @transform_3(%arg0: i32) -> (i32, i32) {
    %c0_i32 = arith.constant 0 : i32
    %c0_i32_0 = arith.constant 0 : i32
    return %arg0, %c0_i32 : i32, i32
  }
}

</mosaic_0001>

<bundles_post_ra>
// kernel: tpu_custom_call.1
= control target key start
LH: loop header
LB: loop body
LE: loop exit
PB: predicated region body
PF: predicated region fallthrough
CT: control target
= control target key end

     0   :  { %8 = vsyncpa [#allocation3], 0  ;;  %s372_s0 = inlined_call_operand.hbm [shape: f32[32,32], index: 0, kind: input, shape index: {}]   ;;  %s373_s1 = inlined_call_operand.hbm [shape: f32[32,96], index: 1, kind: input, shape index: {}]   ;;  %s374_s2 = inlined_call_operand.vmem [shape: f32[1,96], index: 2, kind: input, shape index: {}]   ;;  %s375_s3 = inlined_call_operand.hbm [shape: f32[32,96], index: 3, kind: output, shape index: {}]  }
   0x1   :  { %9 = vsyncpa [#allocation6], 0 }
   0x2   :  { %10 = vsyncpa [#allocation4], 0  ;;  %s295_s12 = smov [#allocation2]   ;;  %s223_s16 = scalar_lea.hbm %s372_s0, 512 }
   0x3   :  { %s16_s13 = sshll.u32 %s295_s12, 4  ;;  %p224_p0 = scmp.ne.s32.totalorder %s372_s0, %s223_s16  ;;  %s17_s13 = int_to_ptr.vmem [resolvable:$true] %s16_s13 }
   0x4   :  { %p227_p1 = scmp.lt.u32.totalorder %s223_s16, %s372_s0 }
   0x6   :  { %p229_p2 = pnand %p227_p1, %p224_p0 }
   0x8   :  { %232 = shalt.err (!%p229_p2)
}
   0x9   :  { %s233_s21 = scalar_lea.vmem %s17_s13, 512  ;;  %p238_p4 = scmp.lt.s32.totalorder %s17_s13, %s17_s13 }
   0xa   :  { %p234_p3 = scmp.ne.s32.totalorder %s17_s13, %s233_s21  ;;  %p239_p5 = scmp.lt.s32.totalorder %s233_s21, %s233_s21 }
   0xc   :  { %p240_p6 = por %p239_p5, %p238_p4 }
   0xe   :  { %p241_p7 = pnand %p240_p6, %p234_p3 }
  0x10   :  { %244 = shalt.err (!%p241_p7)
}
  0x11   :  { %s296_s22 = smov 128   ;;  %s297_s23 = smov 8  }
  0x12   :  { %22 = dma.hbm_to_vmem [thread:$0]  %s372_s0, 512, %s17_s13, [#allocation3], %s296_s22, %s296_s22, %s297_s23  }
  0x13   :  { %s298_s26 = smov [#allocation5]   ;;  %s245_s30 = scalar_lea.hbm %s373_s1, 512 }
  0x14   :  { %s28_s27 = sshll.u32 %s298_s26, 4  ;;  %p246_p8 = scmp.ne.s32.totalorder %s373_s1, %s245_s30  ;;  %s29_s27 = int_to_ptr.vmem [resolvable:$true] %s28_s27 }
  0x15   :  { %p249_p9 = scmp.lt.u32.totalorder %s245_s30, %s373_s1 }
  0x17   :  { %p251_p10 = pnand %p249_p9, %p246_p8 }
  0x19   :  { %254 = shalt.err (!%p251_p10)
}
  0x1a   :  { %s255_s8 = scalar_lea.vmem %s29_s27, 512  ;;  %p260_p12 = scmp.lt.s32.totalorder %s29_s27, %s29_s27 }
  0x1b   :  { %p256_p11 = scmp.ne.s32.totalorder %s29_s27, %s255_s8  ;;  %p261_p13 = scmp.lt.s32.totalorder %s255_s8, %s255_s8 }
  0x1d   :  { %p262_p0 = por %p261_p13, %p260_p12 }
  0x1f   :  { %p263_p1 = pnand %p262_p0, %p256_p11 }
  0x21   :  { %266 = shalt.err (!%p263_p1)
}
  0x22   :  { %34 = dma.hbm_to_vmem [thread:$0]  %s373_s1, 512, %s29_s27, [#allocation6], %s296_s22, %s296_s22, %s297_s23  }
  0x23   :  { %289 = dma.done.wait [#allocation3], 512  }
  0x24   :  { %290 = vsyncadd [#allocation3], 4294966784 }
  0x25   :  { %291 = dma.done.wait [#allocation6], 512  }
  0x26   :  { %292 = vsyncadd [#allocation6], 4294966784  ;;  %vm58_vm0 = vcmask 261120   ;;  %v47_v0 = vld [vmem:[#allocation5] sm:$0xff]  ;;  %v48_v1 = vld [vmem:[#allocation5 + $0x8] sm:$0xff]  ;;  %s299_s11 = smov [#allocation7]  }
  0x27   :  { %v49_v2 = vld [vmem:[#allocation5 + $0x10] sm:$0xff]  ;;  %v206_v3 = vpack.c.bf16 %v48_v1, %v47_v0  ;;  %v50_v4 = vld [vmem:[#allocation5 + $0x18] sm:$0xff]  ;;  %v43_v5 = vld [vmem:[#allocation2] sm:$0xff]  ;;  %s166_s12 = sshll.u32 %s299_s11, 4  ;;  %vm156_vm1 = vcmask 785408   ;;  %s167_s12 = int_to_ptr.vmem [resolvable:$true] %s166_s12 }
  0x28   :  { %v45_v6 = vld [vmem:[#allocation2 + $0x10] sm:$0xff]  ;;  %v210_v7 = vpack.c.bf16 %v50_v4, %v49_v2  ;;  %200 = vmatprep.mubr.msk.f32.mxu0 %vm58_vm0, %v43_v5  ;;  %v44_v8 = vld [vmem:[#allocation2 + $0x8] sm:$0xff]  ;;  %v46_v9 = vld [vmem:[#allocation2 + $0x18] sm:$0xff]  ;;  %s267_s13 = scalar_lea.vmem %s167_s12, 512  ;;  %p272_p3 = scmp.lt.s32.totalorder %s167_s12, %s167_s12 }
  0x29   :  { %203 = vmatprep.mubr.msk.f32.mxu1 %vm58_vm0, %v45_v6  ;;  %207 = vmatprep.subr.bf16.mxu0 %v206_v3  ;;  %v179_v10 = vld [vmem:[%s374_s2] ss:$0 sm:$0xff]  ;;  %p268_p2 = scmp.ne.s32.totalorder %s167_s12, %s267_s13  ;;  %p273_p4 = scmp.lt.s32.totalorder %s267_s13, %s267_s13 }
  0x2a   :  { %214 = vmatprep.subr.bf16.mxu1 %v206_v3  ;;  %209 = vmatpush3.bf16.msra.mxu0 %v206_v3 }
  0x2b   :  { %216 = vmatpush3.bf16.msra.mxu1 %v206_v3  ;;  %211 = vmatprep.subr.bf16.mxu0 %v210_v7  ;;  %p274_p5 = por %p273_p4, %p272_p3 }
  0x2c   :  { %215 = vmatprep.subr.bf16.mxu1 %v210_v7 }
  0x2d   :  { %p275_p6 = pnand %p274_p5, %p268_p2 }
  0x2e   :  { %213 = vmatpush3.bf16.msra.mxu0 %v210_v7 }
  0x2f   :  { %217 = vmatpush3.bf16.msra.mxu1 %v210_v7 }
  0x31   :  { %201 = vmatmul.mubr.msk.f32.vlgmr.msra.gmra.mrb[0].mxu0 %vm58_vm0, %v44_v8 }
  0x32   :  { %204 = vmatmul.mubr.msk.f32.vlgmr.msra.gmra.mrb[0].mxu1 %vm58_vm0, %v46_v9 }
 0x104   :  { %v202_v11 = vpop.f32.mrb[0].mxu0 }
 0x105   :  { %v205_v12 = vpop.f32.mrb[0].mxu1  ;;  %v143_v13 = vadd.f32 %v202_v11, %v179_v10  ;;  %v137_v15 = vpop.f32.mrb[1].mxu0 }
 0x106   :  { %v153_v14 = vadd.f32 %v205_v12, %v179_v10  ;;  %v147_v16 = vpop.f32.mrb[1].mxu1  ;;  %v138_v17 = vadd.f32 %v179_v10, %v137_v15 }
 0x107   :  { %v148_v18 = vadd.f32 %v179_v10, %v147_v16  ;;  %158 = vst.msk [vmem:[#allocation7 + $0x8] sm:$0xff] %vm156_vm1, %v143_v13 }
 0x108   :  { %160 = vst.msk [vmem:[#allocation7 + $0x18] sm:$0xff] %vm156_vm1, %v153_v14  ;;  %157 = vst.msk [vmem:[#allocation7] sm:$0xff] %vm156_vm1, %v138_v17 }
 0x109   :  { %159 = vst.msk [vmem:[#allocation7 + $0x10] sm:$0xff] %vm156_vm1, %v148_v18 }
 0x10a   :  { %278 = shalt.err (!%p275_p6)
}
 0x10b   :  { %s279_s15 = scalar_lea.hbm %s375_s3, 512 }
 0x10c   :  { %p280_p7 = scmp.ne.s32.totalorder %s375_s3, %s279_s15  ;;  %p283_p8 = scmp.lt.u32.totalorder %s279_s15, %s375_s3 }
 0x10e   :  { %p285_p9 = pnand %p283_p8, %p280_p7 }
 0x110   :  { %288 = shalt.err (!%p285_p9)
}
 0x111   :  { %172 = dma.vmem_to_hbm [thread:$0]  %s167_s12, 512, %s375_s3, [#allocation4], %s296_s22, %s296_s22, %s297_s23  }
 0x112   :  { %293 = dma.done.wait [#allocation4], 512  }
 0x113   :  { %294 = vsyncadd [#allocation4], 4294966784 }
 0x114   :  { %176 = vsyncpa [#allocation3], 1 }
 0x115   :  { %177 = vsyncpa [#allocation6], 1 }
 0x116   :  { %178 = vsyncpa [#allocation4], 1 }

</bundles_post_ra>
